<compile_context>
chip_gen: v7x
topology: tpu7x:2x2x1
jax: 0.10.0
libtpu: 0.0.40
codegen_flags: <defaults>
</compile_context>

<pallas_src>
import math

import jax
import jax.numpy as jnp
from jax.experimental import pallas as pl
from jax.experimental.pallas import tpu as pltpu


def _pair(v):
    return (v, v) if isinstance(v, int) else tuple(v)


def _round_up(v, m):
    return ((v + m - 1) // m) * m


def _cdiv(a, b):
    return -(-a // b)


# ---------------------------------------------------------------------------
# Pallas kernels: one (super-group, m-tile, n-tile) output block, accumulated
# over the K grid axis (innermost, "arbitrary").
# ---------------------------------------------------------------------------
def _conv_mm_kernel_f32out(x_ref, w_ref, b_ref, o_ref):
    # x_ref: (1, tm, tk)  w_ref: (1, tk, tn)  b_ref: (1, 1, tn)  o_ref: (1, tm, tn) f32
    # Output dtype is f32 -> the resident output block itself is the accumulator
    # (no scratch, no finalize copy).
    k = pl.program_id(3)

    @pl.when(k == 0)
    def _init():
        o_ref[0] = jnp.broadcast_to(b_ref[0], o_ref.shape[1:])

    o_ref[0] += jnp.dot(x_ref[0], w_ref[0], preferred_element_type=jnp.float32)


def _conv_mm_kernel_castout(x_ref, w_ref, b_ref, o_ref, acc_ref):
    # Same, but with an f32 VMEM accumulator; bias add + cast only at finalize
    # (used when the output dtype is not f32, e.g. bf16 inputs).
    k = pl.program_id(3)

    @pl.when(k == 0)
    def _init():
        acc_ref[...] = jnp.zeros_like(acc_ref)

    acc_ref[...] += jnp.dot(x_ref[0], w_ref[0], preferred_element_type=jnp.float32)

    @pl.when(k == pl.num_programs(3) - 1)
    def _finalize():
        o_ref[0] = (acc_ref[...] + b_ref[0]).astype(o_ref.dtype)


# ---------------------------------------------------------------------------
# Tiling helpers
# ---------------------------------------------------------------------------
def _merge_factor(groups, k_g, cout_g):
    """Fold `f` consecutive groups into one block-diagonal matmul when that
    reduces padded MXU work (useful for small per-group K / Cout)."""
    best_f, best_cost = 1, None
    for f in range(1, groups + 1):
        if groups % f:
            continue
        cost = (groups // f) * _round_up(f * k_g, 128) * _round_up(f * cout_g, 128)
        if best_cost is None or cost < best_cost:
            best_f, best_cost = f, cost
    return best_f


def _pick_lane_tile(dim_pad, max_tile=512):
    """Largest multiple of 128 (<= max_tile) that divides dim_pad.  dim_pad is a
    multiple of 128 so this terminates at >= 128; prefers 256/512-wide tiles for
    the 256-wide v6e/v7x MXU whenever dim_pad allows."""
    t = min(max_tile, dim_pad)
    while dim_pad % t:
        t -= 128
    return t


# ---------------------------------------------------------------------------
# Wrapper: slim im2col (layout only) + tiled Pallas matmul + reshape to NCHW
# ---------------------------------------------------------------------------
def conv2d_pallas(x, weight, bias=None, stride=1, padding=0, dilation=1,
                  groups=1, padding_mode='zeros', compute_dtype=None):
    """Forward pass matching torch.nn.functional.conv2d semantics.

    x      : [N, Cin, H, W]                (NCHW, like PyTorch)
    weight : [Cout, Cin//groups, KH, KW]   (OIHW, like PyTorch)
    bias   : [Cout] or None
    returns: [N, Cout, OH, OW]  (same dtype as x)
    """
    sh, sw = _pair(stride)
    ph, pw = _pair(padding)
    dh, dw = _pair(dilation)

    if padding_mode == 'circular':
        # torch: F.pad(x, ((pw+1)//2, pw//2, (ph+1)//2, ph//2), mode='circular'),
        # then conv2d with zero padding.
        x = jnp.pad(x, ((0, 0), (0, 0),
                        ((ph + 1) // 2, ph // 2),
                        ((pw + 1) // 2, pw // 2)), mode='wrap')
        ph = pw = 0
    elif padding_mode != 'zeros':
        raise NotImplementedError(f"padding_mode={padding_mode!r} not supported")

    N, Cin, H, W = x.shape
    Cout, Cin_g, KH, KW = weight.shape
    assert Cin % groups == 0 and Cout % groups == 0
    assert Cin_g == Cin // groups
    Cout_g = Cout // groups

    OH = (H + 2 * ph - dh * (KH - 1) - 1) // sh + 1
    OW = (W + 2 * pw - dw * (KW - 1) - 1) // sw + 1
    assert OH > 0 and OW > 0, "empty output"

    out_dtype = x.dtype
    cdtype = jnp.dtype(compute_dtype) if compute_dtype is not None else jnp.dtype(x.dtype)

    # ---- group folding (block-diagonal weight) for small per-group dims ----
    K_g = Cin_g * KH * KW
    f = _merge_factor(groups, K_g, Cout_g)
    Ge = groups // f               # number of "super-groups"
    C_sg = f * Cin_g               # input channels per super-group
    Cn_sg = f * Cout_g             # output channels per super-group
    K_sg = KH * KW * C_sg          # contraction length per super-group

    M = N * OH * OW

    # ---- tile sizing --------------------------------------------------------
    itemsize = cdtype.itemsize
    sublane = {4: 8, 2: 16, 1: 32}.get(itemsize, 8)   # dtype-aware sublane tiling

    K_pad = _round_up(K_sg, 128)
    Cn_pad = _round_up(Cn_sg, 128)
    tk = _pick_lane_tile(K_pad)
    tn = _pick_lane_tile(Cn_pad)

    # Balance tm (avoid e.g. M=1025 padding all the way to 2048).
    m_tiles = max(1, _cdiv(M, 1024))
    tm = max(sublane, _round_up(_cdiv(M, m_tiles), sublane))
    m_tiles = _cdiv(M, tm)
    n_tiles = Cn_pad // tn
    # Guarantee >=2 steps along the parallel axes so both v7x TensorCores work.
    if Ge * m_tiles * n_tiles < 2 and M > sublane:
        tm = max(sublane, _round_up(_cdiv(M, 2), sublane))
        m_tiles = _cdiv(M, tm)

    # Keep the double-buffered working set well inside every generation's VMEM
    # (v7x has only 64 MiB per TensorCore).
    def _vmem_use(tm_):
        return (2 * (tm_ * tk + tk * tn) * itemsize   # x, w double-buffered
                + 2 * tm_ * tn * 4                    # output blocks
                + tm_ * tn * 4                        # f32 scratch (worst case)
                + 2 * tn * 4)                         # bias
    while tm > sublane and _vmem_use(tm) > 36 * 1024 * 1024:
        tm = max(sublane, _round_up(tm // 2, sublane))
    m_tiles = _cdiv(M, tm)
    k_tiles = K_pad // tk

    # ---- operand construction (layout only; no big post-hoc jnp.pad on x) ---
    xp = jnp.pad(x, ((0, 0), (0, 0), (ph, ph), (pw, pw)))
    xp = jnp.transpose(xp, (0, 2, 3, 1)).astype(cdtype)        # [N, Hp, Wp, Cin]

    x_parts = []
    for sg in range(Ge):
        chunks = []
        for kh in range(KH):
            for kw in range(KW):
                h0, w0 = kh * dh, kw * dw
                sl = xp[:, h0:h0 + sh * (OH - 1) + 1:sh,
                           w0:w0 + sw * (OW - 1) + 1:sw,
                           sg * C_sg:(sg + 1) * C_sg]          # [N, OH, OW, C_sg]
                chunks.append(sl)
        if K_pad > K_sg:   # K zero-pad folded into the same concatenate
            chunks.append(jnp.zeros((N, OH, OW, K_pad - K_sg), dtype=cdtype))
        x_parts.append(jnp.concatenate(chunks, axis=-1).reshape(M, K_pad))
    x_g = jnp.stack(x_parts, axis=0)                           # [Ge, M, K_pad]

    # Block-diagonal (over the f folded groups) weight, (kh,kw,ci)-major K.
    w_ohwi = jnp.transpose(weight, (0, 2, 3, 1))               # [Cout, KH, KW, Cin_g]
    w6 = jnp.transpose(w_ohwi.reshape(Ge, f, Cout_g, KH, KW, Cin_g),
                       (0, 3, 4, 1, 5, 2))                     # [Ge, KH, KW, f, Cin_g, Cout_g]
    eye_f = jnp.eye(f, dtype=w6.dtype)
    w_bd = jnp.einsum('ghwfco,fF->ghwfcFo', w6, eye_f)         # zero off-diagonal blocks
    w_bd = w_bd.reshape(Ge, K_sg, Cn_sg).astype(cdtype)
    w_bd = jnp.pad(w_bd, ((0, 0), (0, K_pad - K_sg), (0, Cn_pad - Cn_sg)))

    if bias is None:
        b = jnp.zeros((Ge, 1, Cn_pad), dtype=jnp.float32)
    else:
        b = bias.astype(jnp.float32).reshape(Ge, 1, Cn_sg)
        b = jnp.pad(b, ((0, 0), (0, 0), (0, Cn_pad - Cn_sg)))

    grid = (Ge, m_tiles, n_tiles, k_tiles)

    # True (unpadded) flops; x re-read per N-tile, weight re-read per M-tile.
    cost = pl.CostEstimate(
        flops=int(2 * M * K_g * Cout),
        transcendentals=0,
        bytes_accessed=int(Ge * M * K_pad * itemsize * n_tiles
                           + Ge * K_pad * Cn_pad * itemsize * m_tiles
                           + Ge * M * Cn_pad * jnp.dtype(out_dtype).itemsize
                           + Ge * Cn_pad * 4))

    f32_out = out_dtype == jnp.float32
    kernel = _conv_mm_kernel_f32out if f32_out else _conv_mm_kernel_castout
    scratch = [] if f32_out else [pltpu.VMEM((tm, tn), jnp.float32)]

    out_padded = pl.pallas_call(
        kernel,
        out_shape=jax.ShapeDtypeStruct((Ge, M, Cn_pad), out_dtype),
        grid_spec=pltpu.PrefetchScalarGridSpec(
            num_scalar_prefetch=0,
            grid=grid,
            in_specs=[
                pl.BlockSpec((1, tm, tk), lambda g, i, j, k: (g, i, k)),
                pl.BlockSpec((1, tk, tn), lambda g, i, j, k: (g, k, j)),
                # bias block independent of i/k -> stays resident across M & K
                pl.BlockSpec((1, 1, tn), lambda g, i, j, k: (g, 0, j)),
            ],
            out_specs=pl.BlockSpec((1, tm, tn), lambda g, i, j, k: (g, i, j)),
            scratch_shapes=scratch,
        ),
        compiler_params=pltpu.CompilerParams(
            dimension_semantics=("parallel", "parallel", "parallel", "arbitrary"),
            vmem_limit_bytes=48 * 1024 * 1024,   # leaves headroom on v7x 64 MiB/TC
        ),
        cost_estimate=cost,
    )(x_g, w_bd, b)

    # ---- strip padded output channels and restore NCHW ----------------------
    out = out_padded[:, :, :Cn_sg]                             # [Ge, M, Cn_sg]
    out = out.reshape(Ge, N, OH, OW, Cn_sg)
    out = jnp.transpose(out, (1, 0, 4, 2, 3))                  # [N, Ge, Cn_sg, OH, OW]
    return out.reshape(N, Cout, OH, OW)


# ---------------------------------------------------------------------------
# Parameter init matching _ConvNd.reset_parameters (kaiming_uniform a=sqrt(5)
# == U(-1/sqrt(fan_in), 1/sqrt(fan_in)))
# ---------------------------------------------------------------------------
def init_conv2d_params(key, in_channels, out_channels, kernel_size, groups, use_bias):
    kh, kw = _pair(kernel_size)
    fan_in = (in_channels // groups) * kh * kw
    bound = 1.0 / math.sqrt(fan_in)
    k_w, k_b = jax.random.split(key)
    weight = jax.random.uniform(
        k_w, (out_channels, in_channels // groups, kh, kw),
        minval=-bound, maxval=bound, dtype=jnp.float32)
    bias = None
    if use_bias:
        bias = jax.random.uniform(
            k_b, (out_channels,), minval=-bound, maxval=bound, dtype=jnp.float32)
    return weight, bias


def _reference_conv(x, weight, bias, stride, padding, dilation, groups,
                    padding_mode='zeros'):
    sh, sw = _pair(stride); ph, pw = _pair(padding); dh, dw = _pair(dilation)
    if padding_mode == 'circular':
        x = jnp.pad(x, ((0, 0), (0, 0),
                        ((ph + 1) // 2, ph // 2),
                        ((pw + 1) // 2, pw // 2)), mode='wrap')
        ph = pw = 0
    out = jax.lax.conv_general_dilated(
        x, weight, window_strides=(sh, sw), padding=[(ph, ph), (pw, pw)],
        rhs_dilation=(dh, dw), feature_group_count=groups,
        dimension_numbers=('NCHW', 'OIHW', 'NCHW'))
    if bias is not None:
        out = out + bias[None, :, None, None]
    return out


if __name__ == "__main__":
    key = jax.random.PRNGKey(0)
    k_x, k_p, k_x2, k_p2 = jax.random.split(key, 4)

    # --- Test 1: the bundled module config ----------------------------------
    # Conv2d(4, 8, kernel_size=3, stride=1, padding=1, dilation=1, groups=2, bias=True)
    x = jax.random.normal(k_x, (2, 4, 16, 16), dtype=jnp.float32)
    weight, bias = init_conv2d_params(k_p, 4, 8, 3, groups=2, use_bias=True)
    out = conv2d_pallas(x, weight, bias, stride=1, padding=1, dilation=1,
                        groups=2, padding_mode='zeros')
    out = jax.block_until_ready(out)
    ref = _reference_conv(x, weight, bias, 1, 1, 1, 2)
    assert out.shape == (2, 8, 16, 16), out.shape
    assert out.dtype == x.dtype, out.dtype
    assert jnp.allclose(out, ref, atol=1e-4, rtol=1e-4), "mismatch (grouped conv)"

    # --- Test 2: strided / dilated / asymmetric padding, groups=1 ------------
    x2 = jax.random.normal(k_x2, (2, 3, 11, 13), dtype=jnp.float32)
    w2, b2 = init_conv2d_params(k_p2, 3, 5, 3, groups=1, use_bias=True)
    out2 = conv2d_pallas(x2, w2, b2, stride=(2, 1), padding=(0, 2),
                         dilation=(1, 2), groups=1)
    out2 = jax.block_until_ready(out2)
    ref2 = _reference_conv(x2, w2, b2, (2, 1), (0, 2), (1, 2), 1)
    assert out2.shape == ref2.shape, (out2.shape, ref2.shape)
    assert jnp.allclose(out2, ref2, atol=1e-4, rtol=1e-4), "mismatch (strided/dilated)"

    print("KERNEL_OK")
</pallas_src>

<mosaic_0001>
module attributes {stable_mosaic.version = 11 : i64} {
  func.func @_conv_mm_kernel_f32out(%arg0: i32, %arg1: i32, %arg2: i32, %arg3: i32, %arg4: memref<1x256x128xf32, #tpu.memory_space<vmem>>, %arg5: memref<1x128x128xf32, #tpu.memory_space<vmem>>, %arg6: memref<1x1x128xf32, #tpu.memory_space<vmem>>, %arg7: memref<1x256x128xf32, #tpu.memory_space<vmem>>) attributes {dimension_semantics = [#tpu.dimension_semantics<parallel>, #tpu.dimension_semantics<parallel>, #tpu.dimension_semantics<parallel>, #tpu.dimension_semantics<arbitrary>], iteration_bounds = array<i64: 1, 2, 1, 1>, scalar_prefetch = 0 : i64, scratch_operands = 0 : i64, tpu.core_type = #tpu.core_type<tc>, window_params = [{transform_indices = @transform_0, window_bounds = array<i64: 1, 256, 128>}, {transform_indices = @transform_1, window_bounds = array<i64: 1, 128, 128>}, {transform_indices = @transform_2, window_bounds = array<i64: 1, 1, 128>}, {transform_indices = @transform_3, window_bounds = array<i64: 1, 256, 128>}]} {
    %c0_i32 = arith.constant 0 : i32
    %0 = arith.cmpi eq, %arg3, %c0_i32 : i32
    %1 = arith.extui %0 : i1 to i32
    %c0_i32_0 = arith.constant 0 : i32
    %2 = arith.cmpi ne, %1, %c0_i32_0 : i32
    scf.if %2 {
      %c0_12 = arith.constant 0 : index
      %c0_13 = arith.constant 0 : index
      %c0_14 = arith.constant 0 : index
      %14 = vector.load %arg6[%c0_12, %c0_13, %c0_14] : memref<1x1x128xf32, #tpu.memory_space<vmem>>, vector<1x1x128xf32>
      %15 = vector.shape_cast %14 : vector<1x1x128xf32> to vector<1x128xf32>
      %16 = vector.shape_cast %15 : vector<1x128xf32> to vector<1x128xf32>
      %17 = vector.broadcast %16 : vector<1x128xf32> to vector<256x128xf32>
      %c0_15 = arith.constant 0 : index
      %c0_16 = arith.constant 0 : index
      %c0_17 = arith.constant 0 : index
      %18 = vector.load %arg7[%c0_15, %c0_16, %c0_17] : memref<1x256x128xf32, #tpu.memory_space<vmem>>, vector<1x256x128xf32>
      %19 = vector.shape_cast %18 : vector<1x256x128xf32> to vector<256x128xf32>
      %20 = vector.shape_cast %17 : vector<256x128xf32> to vector<1x256x128xf32>
      tpu.vector_store %arg7[%c0_15, %c0_16, %c0_17], %20 {strides = array<i32>} : memref<1x256x128xf32, #tpu.memory_space<vmem>>, vector<1x256x128xf32>,
    } else {
    }
    %c0 = arith.constant 0 : index
    %c0_1 = arith.constant 0 : index
    %c0_2 = arith.constant 0 : index
    %3 = vector.load %arg7[%c0, %c0_1, %c0_2] : memref<1x256x128xf32, #tpu.memory_space<vmem>>, vector<1x256x128xf32>
    %4 = vector.shape_cast %3 : vector<1x256x128xf32> to vector<256x128xf32>
    %c0_3 = arith.constant 0 : index
    %c0_4 = arith.constant 0 : index
    %c0_5 = arith.constant 0 : index
    %5 = vector.load %arg4[%c0_3, %c0_4, %c0_5] : memref<1x256x128xf32, #tpu.memory_space<vmem>>, vector<1x256x128xf32>
    %6 = vector.shape_cast %5 : vector<1x256x128xf32> to vector<256x128xf32>
    %c0_6 = arith.constant 0 : index
    %c0_7 = arith.constant 0 : index
    %c0_8 = arith.constant 0 : index
    %7 = vector.load %arg5[%c0_6, %c0_7, %c0_8] : memref<1x128x128xf32, #tpu.memory_space<vmem>>, vector<1x128x128xf32>
    %8 = vector.shape_cast %7 : vector<1x128x128xf32> to vector<128x128xf32>
    %cst = arith.constant dense<0.000000e+00> : vector<256x128xf32>
    %9 = tpu.matmul %6, %8, %cst {dimension_numbers = #tpu.dot_dimension_numbers<[1], [0], [0], [1], [0, 0, 1, 1], [], []>} : vector<256x128xf32>, vector<128x128xf32>, vector<256x128xf32> -> vector<256x128xf32>
    %10 = arith.addf %4, %9 : vector<256x128xf32>
    %c0_9 = arith.constant 0 : index
    %c0_10 = arith.constant 0 : index
    %c0_11 = arith.constant 0 : index
    %11 = vector.load %arg7[%c0_9, %c0_10, %c0_11] : memref<1x256x128xf32, #tpu.memory_space<vmem>>, vector<1x256x128xf32>
    %12 = vector.shape_cast %11 : vector<1x256x128xf32> to vector<256x128xf32>
    %13 = vector.shape_cast %10 : vector<256x128xf32> to vector<1x256x128xf32>
    tpu.vector_store %arg7[%c0_9, %c0_10, %c0_11], %13 {strides = array<i32>} : memref<1x256x128xf32, #tpu.memory_space<vmem>>, vector<1x256x128xf32>,
    return
  }
  func.func @transform_0(%arg0: i32, %arg1: i32, %arg2: i32, %arg3: i32) -> (i32, i32, i32) {
    %c0_i32 = arith.constant 0 : i32
    return %arg0, %arg1, %arg3 : i32, i32, i32
  }
  func.func @transform_1(%arg0: i32, %arg1: i32, %arg2: i32, %arg3: i32) -> (i32, i32, i32) {
    %c0_i32 = arith.constant 0 : i32
    return %arg0, %arg3, %arg2 : i32, i32, i32
  }
  func.func @transform_2(%arg0: i32, %arg1: i32, %arg2: i32, %arg3: i32) -> (i32, i32, i32) {
    %c0_i32 = arith.constant 0 : i32
    %c0_i32_0 = arith.constant 0 : i32
    return %arg0, %c0_i32, %arg2 : i32, i32, i32
  }
  func.func @transform_3(%arg0: i32, %arg1: i32, %arg2: i32, %arg3: i32) -> (i32, i32, i32) {
    %c0_i32 = arith.constant 0 : i32
    return %arg0, %arg1, %arg2 : i32, i32, i32
  }
}

</mosaic_0001>

<bundles_post_ra>
// kernel: tpu_custom_call.1
= control target key start
LH: loop header
LB: loop body
LE: loop exit
PB: predicated region body
PF: predicated region fallthrough
CT: control target
= control target key end

     0   :  { %8 = vsyncpa [#allocation3], 0  ;;  %s1621_s0 = inlined_call_operand.hbm [shape: f32[1,512,128], index: 0, kind: input, shape index: {}]   ;;  %s1622_s1 = inlined_call_operand.hbm [shape: f32[1,128,128], index: 1, kind: input, shape index: {}]   ;;  %s1623_s2 = inlined_call_operand.vmem [shape: f32[1,1,128], index: 2, kind: input, shape index: {}]   ;;  %s1624_s3 = inlined_call_operand.hbm [shape: f32[1,512,128], index: 3, kind: output, shape index: {}]  }
   0x1   :  { %10 = vsyncpa [#allocation3 + $0x1], 0 }
   0x2   :  { %11 = vsyncpa [#allocation6], 0 }
   0x3   :  { %12 = vsyncpa [#allocation4], 0 }
   0x4   :  { %14 = vsyncpa [#allocation4 + $0x1], 0  ;;  %s1286_s12 = smov 0   ;;  %s1288_s13 = smov 0  }
   0x5   :  { %s1290_s14 = smov 0   ;;  %s1292_s15 = smov 0  }
   0x6   :  { %s1294_s16 = smov 0   ;;  %s1296_s17 = smov 0  }
   0x7 LB: > { %s839_s18 = sadd.s32 4294967295, %s1257_s17   ;;  %s840_s19 = sadd.s32 4294967294, %s1257_s17   ;;  %s1257_s17 = sphi %s1296_s17, %s20_s17   ;;  %s1253_s16 = sphi %s1294_s16, %s1648_s16   ;;  %s1249_s15 = sphi %s1292_s15, %s1647_s15   ;;  %s1245_s14 = sphi %s1290_s14, %s1646_s14   ;;  %s1241_s13 = sphi %s1288_s13, %s1645_s13   ;;  %s1237_s12 = sphi %s1286_s12, %s1644_s12  }
   0x8   : > { %p70_p0 = scmp.ne.s32.totalorder %s1241_s13, %s1237_s12  ;;  %p1320_p1 = scmp.eq.s32.totalorder %s839_s18, 0 }
   0x9   : > { %p1324_p2 = scmp.eq.s32.totalorder %s839_s18, 1  ;;  %p162_p3 = scmp.eq.s32.totalorder %s840_s19, 1 }
   0xa   : > { %s1629_s20 = scalar_select %p1320_p1, 1, 0 }
   0xb   : > { %s1630_s21 = scalar_select %p1324_p2, 1, 0 }
   0xc   : > { %p1330_p4 = por %p1320_p1, %p70_p0  ;;  %p841_p5 = scmp.ge.s32.totalorder %s1257_s17, 1 }
   0xd   : > { %p1335_p6 = por %p162_p3, %p70_p0  ;;  %p169_p7 = scmp.lt.s32.totalorder %s1257_s17, 3 }
   0xe   : > { %s1631_s22 = scalar_select %p1330_p4, 1, 0 }
   0xf   : > { %s1632_s23 = scalar_select %p1335_p6, 1, 0 }
  0x10   : > { %p1340_p8 = pnand %p841_p5, %p169_p7  ;;  %s1259_s25 = smov [#allocation5]  }
  0x11   : > { %s187_s26 = sshll.u32 %s1259_s25, 4  ;;  %s42_s28 = sadd.s32 1, %s1253_s16  ;;  %s188_s26 = int_to_ptr.vmem [resolvable:$true] %s187_s26 }
  0x12   : > { %s1633_s24 = scalar_select %p1340_p8, 1, 0 }
  0x13   : > { %p1044_p9 = pneg %p1340_p8  ;;  %s1113_s4 = scalar_lea.hbm %s1622_s1, 2048 }
  0x14   : > { %p1114_p12 = scmp.ne.s32.totalorder %s1622_s1, %s1113_s4  ;;  %p1120_p5 = scmp.lt.u32.totalorder %s1113_s4, %s1622_s1 }
  0x15   : > { %p1349_p11 = pnand %p1044_p9, %p1320_p1 }
  0x17   : > { %p1115_p13 = pneg %p1349_p11 }
  0x19   : > { %p1116_p0 = pnand %p1115_p13, %p1114_p12 }
  0x1b   : > { %p1117_p3 = pneg %p1116_p0 }
  0x1d   : > { %p1122_p7 = pnand %p1120_p5, %p1117_p3 }
  0x1f   : > { %1125 = shalt.err (!%p1122_p7)
}
  0x20   : > { %s1126_s9 = scalar_lea.vmem %s188_s26, 2048  ;;  %p1134_p1 = scmp.lt.s32.totalorder %s188_s26, %s188_s26 }
  0x21   : > { %p1127_p9 = scmp.ne.s32.totalorder %s188_s26, %s1126_s9  ;;  %p1135_p4 = scmp.lt.s32.totalorder %s1126_s9, %s1126_s9 }
  0x23   : > { %p1129_p10 = pnand %p1127_p9, %p1115_p13  ;;  %p1136_p8 = por %p1135_p4, %p1134_p1 }
  0x25   : > { %p1130_p6 = pneg %p1129_p10 }
  0x27   : > { %p1137_p2 = pnand %p1136_p8, %p1130_p6 }
  0x29   : > { %1140 = shalt.err (!%p1137_p2)
}
  0x2a   : > { %s1260_s10 = smov 128   ;;  %s1261_s11 = smov 8  }
  0x2b   : > { %1047 = dma.hbm_to_vmem [thread:$0]  (!%p1349_p11), %s1622_s1, 2048, %s188_s26, [#allocation6], %s1260_s10, %s1260_s10, %s1261_s11  }
  0x2c   : > { %p44_p1 = scmp.ge.s32.totalorder %s42_s28, 2  ;;  %s57_s25 = sadd.s32 1, %s1245_s14 }
  0x2d   : > { %p64_p2 = scmp.ne.s32.totalorder %s1245_s14, %s1241_s13  ;;  %p65_p4 = scmp.eq.s32.totalorder %s1257_s17, 0 }
  0x2e   : > { %s1650_s28 = smov (%p44_p1, %s42_s28), 0  ;;  %p1636_p8 = scmp.ne.s32.totalorder %s1630_s21, 0 }
  0x2f   : > { %p1379_p6 = por %p65_p4, %p64_p2  ;;  %s51_s30 = ssub.s32 %s1253_s16, %s1650_s28 }
  0x30   : > { %p1385_p10 = por %p1636_p8, %p64_p2  ;;  %p1057_p12 = scmp.lt.s32.totalorder %s1257_s17, 2 }
  0x31   : > { %p55_p11 = scmp.eq.s32.totalorder %s51_s30, 0  ;;  %s210_s26 = sand.u32 1, %s1245_s14  }
  0x32   : > { %s845_s4 = sshll.u32 %s210_s26, 8  ;;  %s858_s6 = sshll.u32 %s1253_s16, 12 }
  0x33   : > { %s1394_s5 = scalar_select %p55_p11, %s1245_s14, %s57_s25  }
  0x34   : > { %s1400_s9 = scalar_lea.hbm %s1621_s0, %s858_s6  ;;  %s214_s21 = scalar_lea.vmem [#allocation2], %s845_s4 }
  0x35   : > { %s224_s18 = sshll.u32 %s214_s21, 4  ;;  %p1406_p13 = pnand %p1057_p12, %p1379_p6  ;;  %s1402_s18 = int_to_ptr.vmem [resolvable:$true] %s224_s18 }
  0x36   : > { %s1410_s25 = scalar_lea.sflag [#allocation3], %s210_s26  ;;  %s1141_s30 = scalar_lea.hbm %s1400_s9, 4096 }
  0x37   : > { %p1142_p0 = scmp.ne.s32.totalorder %s1400_s9, %s1141_s30  ;;  %p1143_p3 = pneg %p1406_p13 }
  0x38   : > { %s1146_s29 = scalar_lea.hbm %s1621_s0, 8192  ;;  %p1147_p9 = scmp.lt.u32.totalorder %s1400_s9, %s1621_s0 }
  0x39   : > { %p1144_p5 = pnand %p1143_p3, %p1142_p0  ;;  %p1148_p1 = scmp.lt.u32.totalorder %s1146_s29, %s1141_s30 }
  0x3a   : > { %p1150_p4 = scmp.lt.u32.totalorder %s1141_s30, %s1400_s9 }
  0x3b   : > { %p1145_p7 = pneg %p1144_p5  ;;  %p1149_p2 = por %p1148_p1, %p1147_p9 }
  0x3d   : > { %p1151_p6 = por %p1150_p4, %p1149_p2 }
  0x3f   : > { %p1152_p8 = pnand %p1151_p6, %p1145_p7 }
  0x41   : > { %1155 = shalt.err (!%p1152_p8)
}
  0x42   : > { %s1156_s26 = scalar_lea.vmem %s1402_s18, 4096  ;;  %s1262_s21 = smov [#allocation2]  }
  0x43   : > { %p1157_p12 = scmp.ne.s32.totalorder %s1402_s18, %s1156_s26  ;;  %s1161_s4 = sshll.u32 %s1262_s21, 4  ;;  %s1162_s4 = int_to_ptr.vmem [resolvable:$false] %s1161_s4 }
  0x44   : > { %s1163_s6 = scalar_lea.vmem %s1162_s4, 8192  ;;  %p1164_p5 = scmp.lt.s32.totalorder %s1402_s18, %s1162_s4 }
  0x45   : > { %p1159_p11 = pnand %p1157_p12, %p1143_p3  ;;  %p1165_p9 = scmp.lt.s32.totalorder %s1163_s6, %s1156_s26 }
  0x47   : > { %p1160_p0 = pneg %p1159_p11  ;;  %p1166_p1 = por %p1165_p9, %p1164_p5 }
  0x49   : > { %p1167_p2 = pnand %p1166_p1, %p1160_p0 }
  0x4b   : > { %1170 = shalt.err (!%p1167_p2)
}
  0x4c   : > { %1051 = dma.hbm_to_vmem [thread:$0]  (!%p1406_p13), %s1400_s9, 4096, %s1402_s18, %s1410_s25, %s1260_s10, %s1260_s10, %s1261_s11  }
  0x4d   : > { %p1639_p3 = scmp.ne.s32.totalorder %s1633_s24, 0 }
  0x4e   : > { %s1444_s30 = sand.u32 (!%p1639_p3), 1, %s1241_s13   ;;  %p1640_p7 = scmp.ne.s32.totalorder (!%p1639_p3), %s1631_s22, 0 }
  0x4f   : > { %236 = sbr.rel (%p1639_p3) target bundleno = 383 (0x17f), region = 32  ;;  %s849_s29 = sshll.u32 (!%p1639_p3), %s1444_s30, 8 }
  0x50   : > { %s239_s7 = scalar_lea.sflag (!%p1639_p3), [#allocation3], %s1444_s30  ;;  %s1450_s19 = scalar_lea.vmem (!%p1639_p3), [#allocation2], %s849_s29 }
  0x56   : > { %1224 = dma.done.wait (%p1640_p7), %s239_s7, 4096  }
  0x57   : > { %1226 = vsyncadd (%p1640_p7), %s239_s7, 4294963200  ;;  %p1641_p13 = scmp.ne.s32.totalorder %s1629_s20, 0 }
  0x59   : > { %1228 = dma.done.wait (%p1641_p13), [#allocation6], 2048  }
  0x5a   : > { %1230 = vsyncadd (%p1641_p13), [#allocation6], 4294965248  ;;  %v391_v0 = vld [vmem:[#allocation5] sm:$0xff]  ;;  %v392_v1 = vld [vmem:[#allocation5 + $0x8] sm:$0xff]  ;;  %s1503_s24 = scalar_lea.vmem [#allocation7], %s849_s29  ;;  %s859_s10 = sshll.u32 %s1249_s15, 12 }
  0x5b   : > { %v393_v2 = vld [vmem:[#allocation5 + $0x10] sm:$0xff]  ;;  %v988_v3 = vpack.c.bf16 %v392_v1, %v391_v0  ;;  %v394_v4 = vld [vmem:[#allocation5 + $0x18] sm:$0xff]  ;;  %v395_v6 = vld [vmem:[#allocation5 + $0x20] sm:$0xff]  ;;  %s713_s11 = sshll.u32 %s1503_s24, 4  ;;  %s1564_s18 = scalar_lea.hbm %s1624_s3, %s859_s10  ;;  %s1566_s11 = int_to_ptr.vmem [resolvable:$true] %s713_s11 }
  0x5c   : > { %v992_v5 = vpack.c.bf16 %v394_v4, %v393_v2  ;;  %v396_v7 = vld [vmem:[#allocation5 + $0x28] sm:$0xff]  ;;  %v359_v9 = vld [vmem:[%s1450_s19] sm:$0xff]  ;;  %v397_v11 = vld [vmem:[#allocation5 + $0x30] sm:$0xff]  ;;  %s697_s25 = scalar_lea.sflag [#allocation4], %s1444_s30  ;;  %s1171_s8 = scalar_lea.vmem %s1566_s11, 4096 }
  0x5d   : > { %989 = vmatprep.subr.bf16.mxu0 %v988_v3  ;;  %1020 = vmatprep.subr.bf16.mxu1 %v988_v3  ;;  %v996_v8 = vpack.c.bf16 %v396_v7, %v395_v6  ;;  %v375_v10 = vld [vmem:[%s1450_s19 + $0x80] sm:$0xff]  ;;  %v398_v12 = vld [vmem:[#allocation5 + $0x38] sm:$0xff]  ;;  %v400_v15 = vld [vmem:[#allocation5 + $0x48] sm:$0xff]  ;;  %p1172_p4 = scmp.ne.s32.totalorder %s1566_s11, %s1171_s8  ;;  %s1263_s26 = smov [#allocation7]  }
  0x5e   : > { %991 = vmatpush3.bf16.msra.mxu0 %v988_v3  ;;  %1028 = vmatpush3.bf16.msra.mxu1 %v988_v3  ;;  %v1000_v13 = vpack.c.bf16 %v398_v12, %v397_v11  ;;  %v399_v14 = vld [vmem:[#allocation5 + $0x40] sm:$0xff]  ;;  %v401_v17 = vld [vmem:[#allocation5 + $0x50] sm:$0xff]  ;;  %v402_v18 = vld [vmem:[#allocation5 + $0x58] sm:$0xff]  ;;  %s1175_s21 = sshll.u32 %s1263_s26, 4  ;;  %s1176_s21 = int_to_ptr.vmem [resolvable:$false] %s1175_s21 }
  0x5f   : > { %993 = vmatprep.subr.bf16.mxu0 %v992_v5  ;;  %1021 = vmatprep.subr.bf16.mxu1 %v992_v5  ;;  %v1004_v16 = vpack.c.bf16 %v400_v15, %v399_v14  ;;  %v1008_v19 = vpack.c.bf16 %v402_v18, %v401_v17  ;;  %v403_v20 = vld [vmem:[#allocation5 + $0x60] sm:$0xff]  ;;  %v404_v21 = vld [vmem:[#allocation5 + $0x68] sm:$0xff]  ;;  %v405_v23 = vld [vmem:[#allocation5 + $0x70] sm:$0xff]  ;;  %p1173_p6 = pnand %p1172_p4, %p1385_p10  ;;  %s1177_s4 = scalar_lea.vmem %s1176_s21, 8192 }
  0x60   : > { %940 = vmatprep.mubr.f32.mxu0 %v359_v9  ;;  %964 = vmatprep.mubr.f32.mxu1 %v375_v10  ;;  %v1012_v22 = vpack.c.bf16 %v404_v21, %v403_v20  ;;  %v406_v24 = vld [vmem:[#allocation5 + $0x78] sm:$0xff]  ;;  %v360_v26 = vld [vmem:[%s1450_s19 + $0x8] sm:$0xff]  ;;  %v361_v28 = vld [vmem:[%s1450_s19 + $0x10] sm:$0xff]  ;;  %p1178_p12 = scmp.lt.s32.totalorder %s1566_s11, %s1176_s21  ;;  %p1179_p11 = scmp.lt.s32.totalorder %s1177_s4, %s1171_s8 }
  0x61   : > { %v1016_v25 = vpack.c.bf16 %v406_v24, %v405_v23  ;;  %v376_v27 = vld [vmem:[%s1450_s19 + $0x88] sm:$0xff]  ;;  %v377_v29 = vld [vmem:[%s1450_s19 + $0x90] sm:$0xff]  ;;  %v362_v30 = vld [vmem:[%s1450_s19 + $0x18] sm:$0xff]  ;;  %p1174_p8 = pneg %p1173_p6 }
  0x62   : > { %995 = vmatpush3.bf16.msra.mxu0 %v992_v5  ;;  %1029 = vmatpush3.bf16.msra.mxu1 %v992_v5  ;;  %v378_v31 = vld [vmem:[%s1450_s19 + $0x98] sm:$0xff]  ;;  %v363_v32 = vld [vmem:[%s1450_s19 + $0x20] sm:$0xff]  ;;  %v364_v34 = vld [vmem:[%s1450_s19 + $0x28] sm:$0xff]  ;;  %p1180_p0 = por %p1179_p11, %p1178_p12 }
  0x63   : > { %997 = vmatprep.subr.bf16.mxu0 %v996_v8  ;;  %1022 = vmatprep.subr.bf16.mxu1 %v996_v8  ;;  %v379_v33 = vld [vmem:[%s1450_s19 + $0xa0] sm:$0xff]  ;;  %v380_v35 = vld [vmem:[%s1450_s19 + $0xa8] sm:$0xff]  ;;  %v365_v36 = vld [vmem:[%s1450_s19 + $0x30] sm:$0xff] }
  0x64   : > { %v381_v37 = vld [vmem:[%s1450_s19 + $0xb0] sm:$0xff]  ;;  %v366_v38 = vld [vmem:[%s1450_s19 + $0x38] sm:$0xff]  ;;  %v367_v40 = vld [vmem:[%s1450_s19 + $0x40] sm:$0xff]  ;;  %p1181_p5 = pnand %p1180_p0, %p1174_p8 }
  0x65   : > { %v382_v39 = vld [vmem:[%s1450_s19 + $0xb8] sm:$0xff]  ;;  %v383_v41 = vld [vmem:[%s1450_s19 + $0xc0] sm:$0xff]  ;;  %v368_v42 = vld [vmem:[%s1450_s19 + $0x48] sm:$0xff] }
  0x66   : > { %999 = vmatpush3.bf16.msra.mxu0 %v996_v8  ;;  %1030 = vmatpush3.bf16.msra.mxu1 %v996_v8  ;;  %v384_v43 = vld [vmem:[%s1450_s19 + $0xc8] sm:$0xff]  ;;  %v369_v44 = vld [vmem:[%s1450_s19 + $0x50] sm:$0xff]  ;;  %v370_v46 = vld [vmem:[%s1450_s19 + $0x58] sm:$0xff] }
  0x67   : > { %1001 = vmatprep.subr.bf16.mxu0 %v1000_v13  ;;  %1023 = vmatprep.subr.bf16.mxu1 %v1000_v13  ;;  %v385_v45 = vld [vmem:[%s1450_s19 + $0xd0] sm:$0xff]  ;;  %v386_v47 = vld [vmem:[%s1450_s19 + $0xd8] sm:$0xff]  ;;  %v371_v48 = vld [vmem:[%s1450_s19 + $0x60] sm:$0xff] }
  0x68   : > { %v387_v49 = vld [vmem:[%s1450_s19 + $0xe0] sm:$0xff]  ;;  %v372_v50 = vld [vmem:[%s1450_s19 + $0x68] sm:$0xff]  ;;  %v373_v52 = vld [vmem:[%s1450_s19 + $0x70] sm:$0xff] }
  0x69   : > { %v388_v51 = vld [vmem:[%s1450_s19 + $0xe8] sm:$0xff]  ;;  %v389_v53 = vld [vmem:[%s1450_s19 + $0xf0] sm:$0xff]  ;;  %v374_v54 = vld [vmem:[%s1450_s19 + $0x78] sm:$0xff] }
  0x6a   : > { %1003 = vmatpush3.bf16.msra.mxu0 %v1000_v13  ;;  %1031 = vmatpush3.bf16.msra.mxu1 %v1000_v13  ;;  %v390_v55 = vld [vmem:[%s1450_s19 + $0xf8] sm:$0xff]  ;;  %v1495_v56 = vld [vmem:[%s1623_s2] ss:$0 sm:$0xff] }
  0x6b   : > { %1005 = vmatprep.subr.bf16.mxu0 %v1004_v16  ;;  %1024 = vmatprep.subr.bf16.mxu1 %v1004_v16 }
  0x6e   : > { %1007 = vmatpush3.bf16.msra.mxu0 %v1004_v16  ;;  %1032 = vmatpush3.bf16.msra.mxu1 %v1004_v16 }
  0x6f   : > { %1009 = vmatprep.subr.bf16.mxu0 %v1008_v19  ;;  %1025 = vmatprep.subr.bf16.mxu1 %v1008_v19 }
  0x72   : > { %1011 = vmatpush3.bf16.msra.mxu0 %v1008_v19  ;;  %1033 = vmatpush3.bf16.msra.mxu1 %v1008_v19 }
  0x73   : > { %1013 = vmatprep.subr.bf16.mxu0 %v1012_v22  ;;  %1026 = vmatprep.subr.bf16.mxu1 %v1012_v22 }
  0x76   : > { %1015 = vmatpush3.bf16.msra.mxu0 %v1012_v22  ;;  %1034 = vmatpush3.bf16.msra.mxu1 %v1012_v22 }
  0x77   : > { %1017 = vmatprep.subr.bf16.mxu0 %v1016_v25  ;;  %1027 = vmatprep.subr.bf16.mxu1 %v1016_v25 }
  0x7a   : > { %1019 = vmatpush3.bf16.msra.mxu0 %v1016_v25  ;;  %1035 = vmatpush3.bf16.msra.mxu1 %v1016_v25 }
  0x7d   : > { %941 = vmatmul.mubr.f32.vlgmr.msra.gmra.mrb[0].mxu0 %v360_v26  ;;  %965 = vmatmul.mubr.f32.vlgmr.msra.gmra.mrb[0].mxu1 %v376_v27 }
  0x7e   : > { %943 = vmatprep.mubr.f32.mxu0 %v361_v28  ;;  %967 = vmatprep.mubr.f32.mxu1 %v377_v29 }
  0x81   : > { %944 = vmatmul.mubr.f32.gmra.mrb[2].mxu0 %v362_v30  ;;  %968 = vmatmul.mubr.f32.gmra.mrb[2].mxu1 %v378_v31 }
  0x82   : > { %946 = vmatprep.mubr.f32.mxu0 %v363_v32  ;;  %970 = vmatprep.mubr.f32.mxu1 %v379_v33 }
  0x85   : > { %947 = vmatmul.mubr.f32.gmra.mrb[4].mxu0 %v364_v34  ;;  %971 = vmatmul.mubr.f32.gmra.mrb[4].mxu1 %v380_v35 }
  0x86   : > { %949 = vmatprep.mubr.f32.mxu0 %v365_v36  ;;  %973 = vmatprep.mubr.f32.mxu1 %v381_v37 }
  0x89   : > { %950 = vmatmul.mubr.f32.gmra.mrb[6].mxu0 %v366_v38  ;;  %974 = vmatmul.mubr.f32.gmra.mrb[6].mxu1 %v382_v39 }
  0x8a   : > { %952 = vmatprep.mubr.f32.mxu0 %v367_v40  ;;  %976 = vmatprep.mubr.f32.mxu1 %v383_v41 }
  0x8d   : > { %953 = vmatmul.mubr.f32.gmra.mrb[8].mxu0 %v368_v42  ;;  %977 = vmatmul.mubr.f32.gmra.mrb[8].mxu1 %v384_v43 }
  0x8e   : > { %955 = vmatprep.mubr.f32.mxu0 %v369_v44  ;;  %979 = vmatprep.mubr.f32.mxu1 %v385_v45 }
  0x91   : > { %956 = vmatmul.mubr.f32.gmra.mrb[10].mxu0 %v370_v46  ;;  %980 = vmatmul.mubr.f32.gmra.mrb[10].mxu1 %v386_v47 }
  0x92   : > { %958 = vmatprep.mubr.f32.mxu0 %v371_v48  ;;  %982 = vmatprep.mubr.f32.mxu1 %v387_v49 }
  0x95   : > { %959 = vmatmul.mubr.f32.gmra.mrb[12].mxu0 %v372_v50  ;;  %983 = vmatmul.mubr.f32.gmra.mrb[12].mxu1 %v388_v51 }
  0x96   : > { %961 = vmatprep.mubr.f32.mxu0 %v373_v52  ;;  %985 = vmatprep.mubr.f32.mxu1 %v389_v53 }
  0x99   : > { %962 = vmatmul.mubr.f32.gmra.mrb[14].mxu0 %v374_v54  ;;  %986 = vmatmul.mubr.f32.gmra.mrb[14].mxu1 %v390_v55 }
 0x150   : > { %v942_v57 = vpop.f32.mrb[0].mxu0  ;;  %v966_v58 = vpop.f32.mrb[0].mxu1 }
 0x151   : > { %v633_v59 = vadd.f32 %v942_v57, %v1495_v56  ;;  %v649_v60 = vadd.f32 %v966_v58, %v1495_v56  ;;  %v473_v61 = vpop.f32.mrb[1].mxu0  ;;  %v553_v62 = vpop.f32.mrb[1].mxu1 }
 0x152   : > { %v632_v63 = vadd.f32 %v1495_v56, %v473_v61  ;;  %v648_v0 = vadd.f32 %v1495_v56, %v553_v62 }
 0x153   : > { %665 = vst [vmem:[%s1503_s24 + $0x8] sm:$0xff] %v633_v59  ;;  %681 = vst [vmem:[%s1503_s24 + $0x88] sm:$0xff] %v649_v60 }
 0x154   : > { %664 = vst [vmem:[%s1503_s24] sm:$0xff] %v632_v63  ;;  %680 = vst [vmem:[%s1503_s24 + $0x80] sm:$0xff] %v648_v0  ;;  %v945_v1 = vpop.f32.mrb[2].mxu0  ;;  %v969_v2 = vpop.f32.mrb[2].mxu1 }
 0x155   : > { %v635_v3 = vadd.f32 %v945_v1, %v1495_v56  ;;  %v651_v4 = vadd.f32 %v969_v2, %v1495_v56  ;;  %v483_v5 = vpop.f32.mrb[3].mxu0  ;;  %v563_v6 = vpop.f32.mrb[3].mxu1 }
 0x156   : > { %v634_v7 = vadd.f32 %v1495_v56, %v483_v5  ;;  %v650_v8 = vadd.f32 %v1495_v56, %v563_v6 }
 0x157   : > { %667 = vst [vmem:[%s1503_s24 + $0x18] sm:$0xff] %v635_v3  ;;  %683 = vst [vmem:[%s1503_s24 + $0x98] sm:$0xff] %v651_v4 }
 0x158   : > { %666 = vst [vmem:[%s1503_s24 + $0x10] sm:$0xff] %v634_v7  ;;  %682 = vst [vmem:[%s1503_s24 + $0x90] sm:$0xff] %v650_v8  ;;  %v948_v9 = vpop.f32.mrb[4].mxu0  ;;  %v972_v10 = vpop.f32.mrb[4].mxu1 }
 0x159   : > { %v637_v11 = vadd.f32 %v948_v9, %v1495_v56  ;;  %v653_v12 = vadd.f32 %v972_v10, %v1495_v56  ;;  %v493_v13 = vpop.f32.mrb[5].mxu0  ;;  %v573_v14 = vpop.f32.mrb[5].mxu1 }
 0x15a   : > { %v636_v15 = vadd.f32 %v1495_v56, %v493_v13  ;;  %v652_v16 = vadd.f32 %v1495_v56, %v573_v14 }
 0x15b   : > { %669 = vst [vmem:[%s1503_s24 + $0x28] sm:$0xff] %v637_v11  ;;  %685 = vst [vmem:[%s1503_s24 + $0xa8] sm:$0xff] %v653_v12 }
 0x15c   : > { %668 = vst [vmem:[%s1503_s24 + $0x20] sm:$0xff] %v636_v15  ;;  %684 = vst [vmem:[%s1503_s24 + $0xa0] sm:$0xff] %v652_v16  ;;  %v951_v17 = vpop.f32.mrb[6].mxu0  ;;  %v975_v18 = vpop.f32.mrb[6].mxu1 }
 0x15d   : > { %v639_v19 = vadd.f32 %v951_v17, %v1495_v56  ;;  %v655_v20 = vadd.f32 %v975_v18, %v1495_v56  ;;  %v503_v21 = vpop.f32.mrb[7].mxu0  ;;  %v583_v22 = vpop.f32.mrb[7].mxu1 }
 0x15e   : > { %v638_v23 = vadd.f32 %v1495_v56, %v503_v21  ;;  %v654_v24 = vadd.f32 %v1495_v56, %v583_v22 }
 0x15f   : > { %671 = vst [vmem:[%s1503_s24 + $0x38] sm:$0xff] %v639_v19  ;;  %687 = vst [vmem:[%s1503_s24 + $0xb8] sm:$0xff] %v655_v20 }
 0x160   : > { %670 = vst [vmem:[%s1503_s24 + $0x30] sm:$0xff] %v638_v23  ;;  %686 = vst [vmem:[%s1503_s24 + $0xb0] sm:$0xff] %v654_v24  ;;  %v954_v25 = vpop.f32.mrb[8].mxu0  ;;  %v978_v26 = vpop.f32.mrb[8].mxu1 }
 0x161   : > { %v641_v27 = vadd.f32 %v954_v25, %v1495_v56  ;;  %v657_v28 = vadd.f32 %v978_v26, %v1495_v56  ;;  %v513_v29 = vpop.f32.mrb[9].mxu0  ;;  %v593_v30 = vpop.f32.mrb[9].mxu1 }
 0x162   : > { %v640_v31 = vadd.f32 %v1495_v56, %v513_v29  ;;  %v656_v32 = vadd.f32 %v1495_v56, %v593_v30 }
 0x163   : > { %673 = vst [vmem:[%s1503_s24 + $0x48] sm:$0xff] %v641_v27  ;;  %689 = vst [vmem:[%s1503_s24 + $0xc8] sm:$0xff] %v657_v28 }
 0x164   : > { %672 = vst [vmem:[%s1503_s24 + $0x40] sm:$0xff] %v640_v31  ;;  %688 = vst [vmem:[%s1503_s24 + $0xc0] sm:$0xff] %v656_v32  ;;  %v957_v33 = vpop.f32.mrb[10].mxu0  ;;  %v981_v34 = vpop.f32.mrb[10].mxu1 }
 0x165   : > { %v643_v35 = vadd.f32 %v957_v33, %v1495_v56  ;;  %v659_v36 = vadd.f32 %v981_v34, %v1495_v56  ;;  %v523_v37 = vpop.f32.mrb[11].mxu0  ;;  %v603_v38 = vpop.f32.mrb[11].mxu1 }
 0x166   : > { %v642_v39 = vadd.f32 %v1495_v56, %v523_v37  ;;  %v658_v40 = vadd.f32 %v1495_v56, %v603_v38 }
 0x167   : > { %675 = vst [vmem:[%s1503_s24 + $0x58] sm:$0xff] %v643_v35  ;;  %691 = vst [vmem:[%s1503_s24 + $0xd8] sm:$0xff] %v659_v36 }
 0x168   : > { %674 = vst [vmem:[%s1503_s24 + $0x50] sm:$0xff] %v642_v39  ;;  %690 = vst [vmem:[%s1503_s24 + $0xd0] sm:$0xff] %v658_v40  ;;  %v960_v41 = vpop.f32.mrb[12].mxu0  ;;  %v984_v42 = vpop.f32.mrb[12].mxu1 }
 0x169   : > { %v645_v43 = vadd.f32 %v960_v41, %v1495_v56  ;;  %v661_v44 = vadd.f32 %v984_v42, %v1495_v56  ;;  %v533_v45 = vpop.f32.mrb[13].mxu0  ;;  %v613_v46 = vpop.f32.mrb[13].mxu1 }
 0x16a   : > { %v644_v47 = vadd.f32 %v1495_v56, %v533_v45  ;;  %v660_v48 = vadd.f32 %v1495_v56, %v613_v46 }
 0x16b   : > { %677 = vst [vmem:[%s1503_s24 + $0x68] sm:$0xff] %v645_v43  ;;  %693 = vst [vmem:[%s1503_s24 + $0xe8] sm:$0xff] %v661_v44 }
 0x16c   : > { %676 = vst [vmem:[%s1503_s24 + $0x60] sm:$0xff] %v644_v47  ;;  %692 = vst [vmem:[%s1503_s24 + $0xe0] sm:$0xff] %v660_v48  ;;  %v963_v49 = vpop.f32.mrb[14].mxu0  ;;  %v987_v50 = vpop.f32.mrb[14].mxu1 }
 0x16d   : > { %v647_v51 = vadd.f32 %v963_v49, %v1495_v56  ;;  %v663_v52 = vadd.f32 %v987_v50, %v1495_v56  ;;  %v543_v53 = vpop.f32.mrb[15].mxu0  ;;  %v623_v54 = vpop.f32.mrb[15].mxu1 }
 0x16e   : > { %v646_v55 = vadd.f32 %v1495_v56, %v543_v53  ;;  %v662_v57 = vadd.f32 %v1495_v56, %v623_v54 }
 0x16f   : > { %679 = vst [vmem:[%s1503_s24 + $0x78] sm:$0xff] %v647_v51  ;;  %695 = vst [vmem:[%s1503_s24 + $0xf8] sm:$0xff] %v663_v52 }
 0x170   : > { %678 = vst [vmem:[%s1503_s24 + $0x70] sm:$0xff] %v646_v55  ;;  %694 = vst [vmem:[%s1503_s24 + $0xf0] sm:$0xff] %v662_v57 }
 0x171   : > { %1184 = shalt.err (!%p1181_p5)
}
 0x172   : > { %s1185_s6 = scalar_lea.hbm %s1564_s18, 4096  ;;  %s1189_s19 = scalar_lea.hbm %s1624_s3, 8192 }
 0x173   : > { %p1186_p9 = scmp.ne.s32.totalorder %s1564_s18, %s1185_s6  ;;  %p1190_p3 = scmp.lt.u32.totalorder %s1564_s18, %s1624_s3 }
 0x174   : > { %p1191_p7 = scmp.lt.u32.totalorder %s1189_s19, %s1185_s6  ;;  %p1193_p4 = scmp.lt.u32.totalorder %s1185_s6, %s1564_s18 }
 0x175   : > { %p1187_p1 = pnand %p1186_p9, %p1385_p10 }
 0x176   : > { %p1192_p13 = por %p1191_p7, %p1190_p3 }
 0x177   : > { %p1188_p2 = pneg %p1187_p1 }
 0x178   : > { %p1194_p6 = por %p1193_p4, %p1192_p13 }
 0x17a   : > { %p1195_p8 = pnand %p1194_p6, %p1188_p2 }
 0x17c   : > { %1198 = shalt.err (!%p1195_p8)
}
 0x17d   : > { %s1264_s24 = smov 128   ;;  %s1265_s10 = smov 8  }
 0x17e   : > { %1042 = dma.vmem_to_hbm [thread:$0]  (%p1385_p10), %s1566_s11, 4096, %s1564_s18, %s697_s25, %s1264_s24, %s1264_s24, %s1265_s10  }
 0x17f PF: > { %s728_s15 = sand.u32 1, %s1237_s12   ;;  %p1642_p12 = scmp.ne.s32.totalorder %s1632_s23, 0 }
 0x180   : > { %p1643_p11 = scmp.ge.s32.totalorder %s1257_s17, 2  ;;  %s729_s9 = scalar_lea.sflag [#allocation4], %s728_s15 }
 0x182   : > { %p1053_p0 = pnand %p1643_p11, %p1642_p12 }
 0x184   : > { %1232 = dma.done.wait (!%p1053_p0), %s729_s9, 4096  }
 0x185   : > { %1234 = vsyncadd (!%p1053_p0), %s729_s9, 4294963200  ;;  %s20_s17 = sadd.s32 1, %s1257_s17   ;;  %s1644_s12 = smov %s1241_s13 }
 0x186   : > { %p17_p5 = scmp.ge.s32.totalorder %s20_s17, 4   ;;  %s1645_s13 = smov %s1245_s14 }
 0x187   : > { %s1646_s14 = smov %s1394_s5  ;;  %s1647_s15 = smov %s1253_s16 }
 0x188   : > { %s1648_s16 = smov %s1650_s28  ;;  %19 = sbr.rel (!%p17_p5) target bundleno = 7 (0x7), region = 89 }
 0x18f   :  { %734 = vsyncpa [#allocation3], 1 }
 0x190   :  { %736 = vsyncpa [#allocation3 + $0x1], 1 }
 0x191   :  { %737 = vsyncpa [#allocation6], 1 }
 0x192   :  { %738 = vsyncpa [#allocation4], 1 }
 0x193   :  { %740 = vsyncpa [#allocation4 + $0x1], 1 }

</bundles_post_ra>
